<compile_context>
chip_gen: v7x
topology: tpu7x:2x2x1
jax: 0.10.0
libtpu: 0.0.40
codegen_flags: <defaults>
</compile_context>

<pallas_src>
import jax
import jax.numpy as jnp
import numpy as np
from jax import lax
from jax.experimental import pallas as pl
from jax.experimental.pallas import tpu as pltpu

# ---------------- model dims (small, synthetic) ----------------
N = 2              # batch
C_IN = 4           # input channels
H = W = 16         # spatial
C_OUT = 8          # conv output channels
NUM_CLASSES = 10
KH = KW = 3        # conv kernel (padding=1, stride=1 -> "same")

HW = H * W                      # 256 pixels per image
PH, PW = H + 2, W + 2           # 18 x 18 zero-padded image
IMG_P = PH * PW                 # 324 padded lanes per image
P_TOT = N * IMG_P               # 648 padded lanes total
XP_W = 768                      # padded-input scratch width (6 lane-tiles)
L_OUT = 640                     # conv-output lanes (5 lane-tiles)
OUT_OFF = PW + 1                # 19: output lane l <-> padded lane l + 19
K_IM2COL = KH * KW * C_IN       # 36 im2col contraction depth
OUT_LANES = 128                 # lane-dense output slab width

# ---- packed-constants slab layout: one (8, SLAB_W) f32 input --------------
POOL_OFF = 0          # rows 0:N , lanes [0, 640)    GAP pool matrix
HEADW_OFF = 640       # rows 0:8 , lanes [640, 768)  [ I_8 | fc_w.T | 0 ]
HEADB_OFF = 768       # row  0   , lanes [768, 896)  [ 0   | fc_b   | 0 ]
CONVW_OFF = 896       # rows 0:8 , lanes [896, 932)  im2col-packed conv weight
CONVB_OFF = 932       # rows 0:8 , lane  932         conv bias
SLAB_W = 1024


# -------- fused kernel: conv3x3 + bias + ReLU + GAP + linear head ----------
def _fused_kernel(x_ref, p_ref, out_ref, xpad_ref, col_ref):
    # x_ref:    (N, C_IN, H*W)      NCHW input, spatial flattened (free reshape)
    # p_ref:    (8, SLAB_W)         packed constants (layout above)
    # out_ref:  (N, OUT_LANES)      lane-dense output slab
    # xpad_ref: (C_IN, XP_W)        row-padded input, channels on sublanes
    # col_ref:  (K_IM2COL, L_OUT)   im2col tap matrix

    # 1) Row-padded, channels-on-sublane copy of the input.  One coarse zero
    #    fill of (4, 768) is ~6 masked stores; with the row-padded layout the
    #    pad lanes are interleaved per row, so this is cheaper than ~40
    #    scattered pad-only stores.  Interior rows are overwritten below.
    xpad_ref[...] = jnp.zeros((C_IN, XP_W), jnp.float32)
    for n in range(N):
        for h in range(H):
            dst = n * IMG_P + (h + 1) * PW + 1   # row h of image n, col 0
            src = h * W
            xpad_ref[:, dst:dst + W] = x_ref[n, :, src:src + W]

    # 2) im2col: 9 plain lane-offset slices (NO masks, no iota/compare/select),
    #    stacked tightly along sublanes -> every scratch element is written.
    for t in range(KH * KW):
        kh, kw = divmod(t, KW)
        s = kh * PW + kw                         # tap lane offset in [0, 38]
        col_ref[C_IN * t:C_IN * (t + 1), :] = xpad_ref[:, s:s + L_OUT]

    # 3) Whole conv as ONE MXU matmul, then bias + ReLU (single VPU pass).
    cw = p_ref[:, CONVW_OFF:CONVW_OFF + K_IM2COL]      # (8, 36)
    cb = p_ref[:, CONVB_OFF:CONVB_OFF + 1]             # (8, 1)
    acc = jnp.dot(cw, col_ref[...], preferred_element_type=jnp.float32)
    acc = jnp.maximum(acc + cb, 0.0)                   # (8, 640)

    # 4) Global average pool via the constant pool matrix (exact zeros at the
    #    pad/junk lanes kill the garbage conv outputs there).
    pool = p_ref[0:N, POOL_OFF:POOL_OFF + L_OUT]       # (N, 640)
    pooled = lax.dot_general(pool, acc, (((1,), (1,)), ((), ())),
                             preferred_element_type=jnp.float32)  # (N, C_OUT)

    # 5) Fused head: one lane-dense matmul emits [pooled | logits | 0].
    hw = p_ref[:, HEADW_OFF:HEADW_OFF + OUT_LANES]     # (8, 128)
    hb = p_ref[0:1, HEADB_OFF:HEADB_OFF + OUT_LANES]   # (1, 128)
    out_ref[...] = (jnp.dot(pooled, hw, preferred_element_type=jnp.float32)
                    + hb)


def _fused_pallas(x3, slab):
    """Single pallas_call; the whole (tiny) problem lives in VMEM, no grid."""
    vmem = pl.BlockSpec(memory_space=pltpu.MemorySpace.VMEM)
    return pl.pallas_call(
        _fused_kernel,
        out_shape=jax.ShapeDtypeStruct((N, OUT_LANES), jnp.float32),
        in_specs=[vmem, vmem],
        out_specs=vmem,
        scratch_shapes=[pltpu.VMEM((C_IN, XP_W), jnp.float32),
                        pltpu.VMEM((K_IM2COL, L_OUT), jnp.float32)],
        cost_estimate=pl.CostEstimate(flops=400_000, transcendentals=0,
                                      bytes_accessed=42_000),
    )(x3, slab)


# ---------------- "original model" + ModelWrapper semantics ----------------
def original_model(x_nchw, slab):
    """The wrapped model: returns a dict of named outputs (like PyTorch)."""
    # Contiguous NCHW -> (N, C_IN, H*W) is a free reshape; all real layout
    # work (row padding, sublane placement, im2col) happens inside the kernel.
    x3 = x_nchw.reshape(N, C_IN, HW)
    out = _fused_pallas(x3, slab)                       # (N, 128) slab
    return {
        "pooled_features": out[:, :C_OUT],
        "logits": out[:, C_OUT:C_OUT + NUM_CLASSES],
    }


def model_wrapper_forward(x_nchw, slab):
    """Exact ModelWrapper.forward semantics: dict values -> tuple."""
    output_dict = original_model(x_nchw, slab)
    outputs_values = []
    for _key, value in output_dict.items():
        outputs_values.append(value)
    return tuple(outputs_values)


# ---------------- parameter packing (one-off, trace-time) ------------------
def pack_params(params):
    """Re-pack PyTorch-layout parameters + constants into ONE (8,1024) slab."""
    # conv weight -> (C_OUT, 36) with column index (kh*KW + kw) * C_IN + cin,
    # matching the im2col sublane order built in-kernel.
    cw = jnp.transpose(params["conv_w"], (0, 2, 3, 1)).reshape(C_OUT, K_IM2COL)
    cb = params["conv_b"].reshape(C_OUT, 1)

    hw = jnp.zeros((C_OUT, OUT_LANES), jnp.float32)
    hw = hw.at[:, :C_OUT].set(jnp.eye(C_OUT, dtype=jnp.float32))
    hw = hw.at[:, C_OUT:C_OUT + NUM_CLASSES].set(params["fc_w"].T)
    hb = jnp.zeros((1, OUT_LANES), jnp.float32)
    hb = hb.at[:, C_OUT:C_OUT + NUM_CLASSES].set(params["fc_b"][None, :])

    # GAP pool matrix over the row-padded conv-output lane axis: 1/HW at real
    # pixels, exact zeros at every pad / junk lane.
    pool = np.zeros((N, L_OUT), np.float32)
    for n in range(N):
        for h in range(H):
            q0 = n * IMG_P + (h + 1) * PW + 1      # padded lane of pixel (h,0)
            pool[n, q0 - OUT_OFF:q0 - OUT_OFF + W] = 1.0 / HW

    slab = jnp.zeros((C_OUT, SLAB_W), jnp.float32)
    slab = slab.at[0:N, POOL_OFF:POOL_OFF + L_OUT].set(jnp.asarray(pool))
    slab = slab.at[:, HEADW_OFF:HEADW_OFF + OUT_LANES].set(hw)
    slab = slab.at[0:1, HEADB_OFF:HEADB_OFF + OUT_LANES].set(hb)
    slab = slab.at[:, CONVW_OFF:CONVW_OFF + K_IM2COL].set(cw)
    slab = slab.at[:, CONVB_OFF:CONVB_OFF + 1].set(cb)
    return slab


# ---------------- pure-JAX reference for verification ----------------------
def _reference(x_nchw, params):
    y = lax.conv_general_dilated(
        x_nchw, params["conv_w"], window_strides=(1, 1), padding="SAME",
        dimension_numbers=("NCHW", "OIHW", "NCHW"))
    y = jnp.maximum(y + params["conv_b"][None, :, None, None], 0.0)
    pooled = jnp.mean(y, axis=(2, 3))
    logits = pooled @ params["fc_w"].T + params["fc_b"]
    return pooled, logits


if __name__ == "__main__":
    key = jax.random.PRNGKey(0)
    k_x, k_cw, k_cb, k_fw, k_fb = jax.random.split(key, 5)

    # PyTorch-layout parameters (Conv2d: (Cout,Cin,KH,KW); Linear: (out,in)).
    params = {
        "conv_w": jax.random.normal(k_cw, (C_OUT, C_IN, KH, KW),
                                    jnp.float32) * 0.1,
        "conv_b": jax.random.normal(k_cb, (C_OUT,), jnp.float32) * 0.1,
        "fc_w": jax.random.normal(k_fw, (NUM_CLASSES, C_OUT),
                                  jnp.float32) * 0.1,
        "fc_b": jax.random.normal(k_fb, (NUM_CLASSES,), jnp.float32) * 0.1,
    }
    slab = pack_params(params)

    # PyTorch-style NCHW input.
    x = jax.random.normal(k_x, (N, C_IN, H, W), jnp.float32)

    fwd = jax.jit(model_wrapper_forward)
    outputs = jax.block_until_ready(fwd(x, slab))     # tuple, per ModelWrapper

    ref_pooled, ref_logits = _reference(x, params)
    np.testing.assert_allclose(np.asarray(outputs[0]), np.asarray(ref_pooled),
                               rtol=1e-4, atol=1e-5)
    np.testing.assert_allclose(np.asarray(outputs[1]), np.asarray(ref_logits),
                               rtol=1e-4, atol=1e-5)

    assert isinstance(outputs, tuple) and len(outputs) == 2
    print("KERNEL_OK")
</pallas_src>

<mosaic_0001>
module attributes {stable_mosaic.version = 11 : i64} {
  func.func @_fused_kernel(%arg0: memref<2x4x256xf32, #tpu.memory_space<vmem>>, %arg1: memref<8x1024xf32, #tpu.memory_space<vmem>>, %arg2: memref<2x128xf32, #tpu.memory_space<vmem>>, %arg3: memref<4x768xf32, #tpu.memory_space<vmem>>, %arg4: memref<36x640xf32, #tpu.memory_space<vmem>>) attributes {dimension_semantics = [], scalar_prefetch = 0 : i64, scratch_operands = 2 : i64, tpu.core_type = #tpu.core_type<tc>} {
    %cst = arith.constant 0.000000e+00 : f32
    %0 = vector.broadcast %cst : f32 to vector<4x768xf32>
    %c0 = arith.constant 0 : index
    %c0_0 = arith.constant 0 : index
    %1 = vector.load %arg3[%c0, %c0_0] : memref<4x768xf32, #tpu.memory_space<vmem>>, vector<4x768xf32>
    tpu.vector_store %arg3[%c0, %c0_0], %0 {strides = array<i32>} : memref<4x768xf32, #tpu.memory_space<vmem>>, vector<4x768xf32>,
    %c0_1 = arith.constant 0 : index
    %c0_2 = arith.constant 0 : index
    %c0_3 = arith.constant 0 : index
    %2 = vector.load %arg0[%c0_1, %c0_2, %c0_3] : memref<2x4x256xf32, #tpu.memory_space<vmem>>, vector<1x4x16xf32>
    %3 = vector.shape_cast %2 : vector<1x4x16xf32> to vector<4x16xf32>
    %c0_4 = arith.constant 0 : index
    %c19 = arith.constant 19 : index
    %4 = vector.load %arg3[%c0_4, %c19] : memref<4x768xf32, #tpu.memory_space<vmem>>, vector<4x16xf32>
    tpu.vector_store %arg3[%c0_4, %c19], %3 {strides = array<i32>} : memref<4x768xf32, #tpu.memory_space<vmem>>, vector<4x16xf32>,
    %c0_5 = arith.constant 0 : index
    %c0_6 = arith.constant 0 : index
    %c16 = arith.constant 16 : index
    %5 = vector.load %arg0[%c0_5, %c0_6, %c16] : memref<2x4x256xf32, #tpu.memory_space<vmem>>, vector<1x4x16xf32>
    %6 = vector.shape_cast %5 : vector<1x4x16xf32> to vector<4x16xf32>
    %c0_7 = arith.constant 0 : index
    %c37 = arith.constant 37 : index
    %7 = vector.load %arg3[%c0_7, %c37] : memref<4x768xf32, #tpu.memory_space<vmem>>, vector<4x16xf32>
    tpu.vector_store %arg3[%c0_7, %c37], %6 {strides = array<i32>} : memref<4x768xf32, #tpu.memory_space<vmem>>, vector<4x16xf32>,
    %c0_8 = arith.constant 0 : index
    %c0_9 = arith.constant 0 : index
    %c32 = arith.constant 32 : index
    %8 = vector.load %arg0[%c0_8, %c0_9, %c32] : memref<2x4x256xf32, #tpu.memory_space<vmem>>, vector<1x4x16xf32>
    %9 = vector.shape_cast %8 : vector<1x4x16xf32> to vector<4x16xf32>
    %c0_10 = arith.constant 0 : index
    %c55 = arith.constant 55 : index
    %10 = vector.load %arg3[%c0_10, %c55] : memref<4x768xf32, #tpu.memory_space<vmem>>, vector<4x16xf32>
    tpu.vector_store %arg3[%c0_10, %c55], %9 {strides = array<i32>} : memref<4x768xf32, #tpu.memory_space<vmem>>, vector<4x16xf32>,
    %c0_11 = arith.constant 0 : index
    %c0_12 = arith.constant 0 : index
    %c48 = arith.constant 48 : index
    %11 = vector.load %arg0[%c0_11, %c0_12, %c48] : memref<2x4x256xf32, #tpu.memory_space<vmem>>, vector<1x4x16xf32>
    %12 = vector.shape_cast %11 : vector<1x4x16xf32> to vector<4x16xf32>
    %c0_13 = arith.constant 0 : index
    %c73 = arith.constant 73 : index
    %13 = vector.load %arg3[%c0_13, %c73] : memref<4x768xf32, #tpu.memory_space<vmem>>, vector<4x16xf32>
    tpu.vector_store %arg3[%c0_13, %c73], %12 {strides = array<i32>} : memref<4x768xf32, #tpu.memory_space<vmem>>, vector<4x16xf32>,
    %c0_14 = arith.constant 0 : index
    %c0_15 = arith.constant 0 : index
    %c64 = arith.constant 64 : index
    %14 = vector.load %arg0[%c0_14, %c0_15, %c64] : memref<2x4x256xf32, #tpu.memory_space<vmem>>, vector<1x4x16xf32>
    %15 = vector.shape_cast %14 : vector<1x4x16xf32> to vector<4x16xf32>
    %c0_16 = arith.constant 0 : index
    %c91 = arith.constant 91 : index
    %16 = vector.load %arg3[%c0_16, %c91] : memref<4x768xf32, #tpu.memory_space<vmem>>, vector<4x16xf32>
    tpu.vector_store %arg3[%c0_16, %c91], %15 {strides = array<i32>} : memref<4x768xf32, #tpu.memory_space<vmem>>, vector<4x16xf32>,
    %c0_17 = arith.constant 0 : index
    %c0_18 = arith.constant 0 : index
    %c80 = arith.constant 80 : index
    %17 = vector.load %arg0[%c0_17, %c0_18, %c80] : memref<2x4x256xf32, #tpu.memory_space<vmem>>, vector<1x4x16xf32>
    %18 = vector.shape_cast %17 : vector<1x4x16xf32> to vector<4x16xf32>
    %c0_19 = arith.constant 0 : index
    %c109 = arith.constant 109 : index
    %19 = vector.load %arg3[%c0_19, %c109] : memref<4x768xf32, #tpu.memory_space<vmem>>, vector<4x16xf32>
    tpu.vector_store %arg3[%c0_19, %c109], %18 {strides = array<i32>} : memref<4x768xf32, #tpu.memory_space<vmem>>, vector<4x16xf32>,
    %c0_20 = arith.constant 0 : index
    %c0_21 = arith.constant 0 : index
    %c96 = arith.constant 96 : index
    %20 = vector.load %arg0[%c0_20, %c0_21, %c96] : memref<2x4x256xf32, #tpu.memory_space<vmem>>, vector<1x4x16xf32>
    %21 = vector.shape_cast %20 : vector<1x4x16xf32> to vector<4x16xf32>
    %c0_22 = arith.constant 0 : index
    %c127 = arith.constant 127 : index
    %22 = vector.load %arg3[%c0_22, %c127] : memref<4x768xf32, #tpu.memory_space<vmem>>, vector<4x16xf32>
    tpu.vector_store %arg3[%c0_22, %c127], %21 {strides = array<i32>} : memref<4x768xf32, #tpu.memory_space<vmem>>, vector<4x16xf32>,
    %c0_23 = arith.constant 0 : index
    %c0_24 = arith.constant 0 : index
    %c112 = arith.constant 112 : index
    %23 = vector.load %arg0[%c0_23, %c0_24, %c112] : memref<2x4x256xf32, #tpu.memory_space<vmem>>, vector<1x4x16xf32>
    %24 = vector.shape_cast %23 : vector<1x4x16xf32> to vector<4x16xf32>
    %c0_25 = arith.constant 0 : index
    %c145 = arith.constant 145 : index
    %25 = vector.load %arg3[%c0_25, %c145] : memref<4x768xf32, #tpu.memory_space<vmem>>, vector<4x16xf32>
    tpu.vector_store %arg3[%c0_25, %c145], %24 {strides = array<i32>} : memref<4x768xf32, #tpu.memory_space<vmem>>, vector<4x16xf32>,
    %c0_26 = arith.constant 0 : index
    %c0_27 = arith.constant 0 : index
    %c128 = arith.constant 128 : index
    %26 = vector.load %arg0[%c0_26, %c0_27, %c128] : memref<2x4x256xf32, #tpu.memory_space<vmem>>, vector<1x4x16xf32>
    %27 = vector.shape_cast %26 : vector<1x4x16xf32> to vector<4x16xf32>
    %c0_28 = arith.constant 0 : index
    %c163 = arith.constant 163 : index
    %28 = vector.load %arg3[%c0_28, %c163] : memref<4x768xf32, #tpu.memory_space<vmem>>, vector<4x16xf32>
    tpu.vector_store %arg3[%c0_28, %c163], %27 {strides = array<i32>} : memref<4x768xf32, #tpu.memory_space<vmem>>, vector<4x16xf32>,
    %c0_29 = arith.constant 0 : index
    %c0_30 = arith.constant 0 : index
    %c144 = arith.constant 144 : index
    %29 = vector.load %arg0[%c0_29, %c0_30, %c144] : memref<2x4x256xf32, #tpu.memory_space<vmem>>, vector<1x4x16xf32>
    %30 = vector.shape_cast %29 : vector<1x4x16xf32> to vector<4x16xf32>
    %c0_31 = arith.constant 0 : index
    %c181 = arith.constant 181 : index
    %31 = vector.load %arg3[%c0_31, %c181] : memref<4x768xf32, #tpu.memory_space<vmem>>, vector<4x16xf32>
    tpu.vector_store %arg3[%c0_31, %c181], %30 {strides = array<i32>} : memref<4x768xf32, #tpu.memory_space<vmem>>, vector<4x16xf32>,
    %c0_32 = arith.constant 0 : index
    %c0_33 = arith.constant 0 : index
    %c160 = arith.constant 160 : index
    %32 = vector.load %arg0[%c0_32, %c0_33, %c160] : memref<2x4x256xf32, #tpu.memory_space<vmem>>, vector<1x4x16xf32>
    %33 = vector.shape_cast %32 : vector<1x4x16xf32> to vector<4x16xf32>
    %c0_34 = arith.constant 0 : index
    %c199 = arith.constant 199 : index
    %34 = vector.load %arg3[%c0_34, %c199] : memref<4x768xf32, #tpu.memory_space<vmem>>, vector<4x16xf32>
    tpu.vector_store %arg3[%c0_34, %c199], %33 {strides = array<i32>} : memref<4x768xf32, #tpu.memory_space<vmem>>, vector<4x16xf32>,
    %c0_35 = arith.constant 0 : index
    %c0_36 = arith.constant 0 : index
    %c176 = arith.constant 176 : index
    %35 = vector.load %arg0[%c0_35, %c0_36, %c176] : memref<2x4x256xf32, #tpu.memory_space<vmem>>, vector<1x4x16xf32>
    %36 = vector.shape_cast %35 : vector<1x4x16xf32> to vector<4x16xf32>
    %c0_37 = arith.constant 0 : index
    %c217 = arith.constant 217 : index
    %37 = vector.load %arg3[%c0_37, %c217] : memref<4x768xf32, #tpu.memory_space<vmem>>, vector<4x16xf32>
    tpu.vector_store %arg3[%c0_37, %c217], %36 {strides = array<i32>} : memref<4x768xf32, #tpu.memory_space<vmem>>, vector<4x16xf32>,
    %c0_38 = arith.constant 0 : index
    %c0_39 = arith.constant 0 : index
    %c192 = arith.constant 192 : index
    %38 = vector.load %arg0[%c0_38, %c0_39, %c192] : memref<2x4x256xf32, #tpu.memory_space<vmem>>, vector<1x4x16xf32>
    %39 = vector.shape_cast %38 : vector<1x4x16xf32> to vector<4x16xf32>
    %c0_40 = arith.constant 0 : index
    %c235 = arith.constant 235 : index
    %40 = vector.load %arg3[%c0_40, %c235] : memref<4x768xf32, #tpu.memory_space<vmem>>, vector<4x16xf32>
    tpu.vector_store %arg3[%c0_40, %c235], %39 {strides = array<i32>} : memref<4x768xf32, #tpu.memory_space<vmem>>, vector<4x16xf32>,
    %c0_41 = arith.constant 0 : index
    %c0_42 = arith.constant 0 : index
    %c208 = arith.constant 208 : index
    %41 = vector.load %arg0[%c0_41, %c0_42, %c208] : memref<2x4x256xf32, #tpu.memory_space<vmem>>, vector<1x4x16xf32>
    %42 = vector.shape_cast %41 : vector<1x4x16xf32> to vector<4x16xf32>
    %c0_43 = arith.constant 0 : index
    %c253 = arith.constant 253 : index
    %43 = vector.load %arg3[%c0_43, %c253] : memref<4x768xf32, #tpu.memory_space<vmem>>, vector<4x16xf32>
    tpu.vector_store %arg3[%c0_43, %c253], %42 {strides = array<i32>} : memref<4x768xf32, #tpu.memory_space<vmem>>, vector<4x16xf32>,
    %c0_44 = arith.constant 0 : index
    %c0_45 = arith.constant 0 : index
    %c224 = arith.constant 224 : index
    %44 = vector.load %arg0[%c0_44, %c0_45, %c224] : memref<2x4x256xf32, #tpu.memory_space<vmem>>, vector<1x4x16xf32>
    %45 = vector.shape_cast %44 : vector<1x4x16xf32> to vector<4x16xf32>
    %c0_46 = arith.constant 0 : index
    %c271 = arith.constant 271 : index
    %46 = vector.load %arg3[%c0_46, %c271] : memref<4x768xf32, #tpu.memory_space<vmem>>, vector<4x16xf32>
    tpu.vector_store %arg3[%c0_46, %c271], %45 {strides = array<i32>} : memref<4x768xf32, #tpu.memory_space<vmem>>, vector<4x16xf32>,
    %c0_47 = arith.constant 0 : index
    %c0_48 = arith.constant 0 : index
    %c240 = arith.constant 240 : index
    %47 = vector.load %arg0[%c0_47, %c0_48, %c240] : memref<2x4x256xf32, #tpu.memory_space<vmem>>, vector<1x4x16xf32>
    %48 = vector.shape_cast %47 : vector<1x4x16xf32> to vector<4x16xf32>
    %c0_49 = arith.constant 0 : index
    %c289 = arith.constant 289 : index
    %49 = vector.load %arg3[%c0_49, %c289] : memref<4x768xf32, #tpu.memory_space<vmem>>, vector<4x16xf32>
    tpu.vector_store %arg3[%c0_49, %c289], %48 {strides = array<i32>} : memref<4x768xf32, #tpu.memory_space<vmem>>, vector<4x16xf32>,
    %c1 = arith.constant 1 : index
    %c0_50 = arith.constant 0 : index
    %c0_51 = arith.constant 0 : index
    %50 = vector.load %arg0[%c1, %c0_50, %c0_51] : memref<2x4x256xf32, #tpu.memory_space<vmem>>, vector<1x4x16xf32>
    %51 = vector.shape_cast %50 : vector<1x4x16xf32> to vector<4x16xf32>
    %c0_52 = arith.constant 0 : index
    %c343 = arith.constant 343 : index
    %52 = vector.load %arg3[%c0_52, %c343] : memref<4x768xf32, #tpu.memory_space<vmem>>, vector<4x16xf32>
    tpu.vector_store %arg3[%c0_52, %c343], %51 {strides = array<i32>} : memref<4x768xf32, #tpu.memory_space<vmem>>, vector<4x16xf32>,
    %c1_53 = arith.constant 1 : index
    %c0_54 = arith.constant 0 : index
    %c16_55 = arith.constant 16 : index
    %53 = vector.load %arg0[%c1_53, %c0_54, %c16_55] : memref<2x4x256xf32, #tpu.memory_space<vmem>>, vector<1x4x16xf32>
    %54 = vector.shape_cast %53 : vector<1x4x16xf32> to vector<4x16xf32>
    %c0_56 = arith.constant 0 : index
    %c361 = arith.constant 361 : index
    %55 = vector.load %arg3[%c0_56, %c361] : memref<4x768xf32, #tpu.memory_space<vmem>>, vector<4x16xf32>
    tpu.vector_store %arg3[%c0_56, %c361], %54 {strides = array<i32>} : memref<4x768xf32, #tpu.memory_space<vmem>>, vector<4x16xf32>,
    %c1_57 = arith.constant 1 : index
    %c0_58 = arith.constant 0 : index
    %c32_59 = arith.constant 32 : index
    %56 = vector.load %arg0[%c1_57, %c0_58, %c32_59] : memref<2x4x256xf32, #tpu.memory_space<vmem>>, vector<1x4x16xf32>
    %57 = vector.shape_cast %56 : vector<1x4x16xf32> to vector<4x16xf32>
    %c0_60 = arith.constant 0 : index
    %c379 = arith.constant 379 : index
    %58 = vector.load %arg3[%c0_60, %c379] : memref<4x768xf32, #tpu.memory_space<vmem>>, vector<4x16xf32>
    tpu.vector_store %arg3[%c0_60, %c379], %57 {strides = array<i32>} : memref<4x768xf32, #tpu.memory_space<vmem>>, vector<4x16xf32>,
    %c1_61 = arith.constant 1 : index
    %c0_62 = arith.constant 0 : index
    %c48_63 = arith.constant 48 : index
    %59 = vector.load %arg0[%c1_61, %c0_62, %c48_63] : memref<2x4x256xf32, #tpu.memory_space<vmem>>, vector<1x4x16xf32>
    %60 = vector.shape_cast %59 : vector<1x4x16xf32> to vector<4x16xf32>
    %c0_64 = arith.constant 0 : index
    %c397 = arith.constant 397 : index
    %61 = vector.load %arg3[%c0_64, %c397] : memref<4x768xf32, #tpu.memory_space<vmem>>, vector<4x16xf32>
    tpu.vector_store %arg3[%c0_64, %c397], %60 {strides = array<i32>} : memref<4x768xf32, #tpu.memory_space<vmem>>, vector<4x16xf32>,
    %c1_65 = arith.constant 1 : index
    %c0_66 = arith.constant 0 : index
    %c64_67 = arith.constant 64 : index
    %62 = vector.load %arg0[%c1_65, %c0_66, %c64_67] : memref<2x4x256xf32, #tpu.memory_space<vmem>>, vector<1x4x16xf32>
    %63 = vector.shape_cast %62 : vector<1x4x16xf32> to vector<4x16xf32>
    %c0_68 = arith.constant 0 : index
    %c415 = arith.constant 415 : index
    %64 = vector.load %arg3[%c0_68, %c415] : memref<4x768xf32, #tpu.memory_space<vmem>>, vector<4x16xf32>
    tpu.vector_store %arg3[%c0_68, %c415], %63 {strides = array<i32>} : memref<4x768xf32, #tpu.memory_space<vmem>>, vector<4x16xf32>,
    %c1_69 = arith.constant 1 : index
    %c0_70 = arith.constant 0 : index
    %c80_71 = arith.constant 80 : index
    %65 = vector.load %arg0[%c1_69, %c0_70, %c80_71] : memref<2x4x256xf32, #tpu.memory_space<vmem>>, vector<1x4x16xf32>
    %66 = vector.shape_cast %65 : vector<1x4x16xf32> to vector<4x16xf32>
    %c0_72 = arith.constant 0 : index
    %c433 = arith.constant 433 : index
    %67 = vector.load %arg3[%c0_72, %c433] : memref<4x768xf32, #tpu.memory_space<vmem>>, vector<4x16xf32>
    tpu.vector_store %arg3[%c0_72, %c433], %66 {strides = array<i32>} : memref<4x768xf32, #tpu.memory_space<vmem>>, vector<4x16xf32>,
    %c1_73 = arith.constant 1 : index
    %c0_74 = arith.constant 0 : index
    %c96_75 = arith.constant 96 : index
    %68 = vector.load %arg0[%c1_73, %c0_74, %c96_75] : memref<2x4x256xf32, #tpu.memory_space<vmem>>, vector<1x4x16xf32>
    %69 = vector.shape_cast %68 : vector<1x4x16xf32> to vector<4x16xf32>
    %c0_76 = arith.constant 0 : index
    %c451 = arith.constant 451 : index
    %70 = vector.load %arg3[%c0_76, %c451] : memref<4x768xf32, #tpu.memory_space<vmem>>, vector<4x16xf32>
    tpu.vector_store %arg3[%c0_76, %c451], %69 {strides = array<i32>} : memref<4x768xf32, #tpu.memory_space<vmem>>, vector<4x16xf32>,
    %c1_77 = arith.constant 1 : index
    %c0_78 = arith.constant 0 : index
    %c112_79 = arith.constant 112 : index
    %71 = vector.load %arg0[%c1_77, %c0_78, %c112_79] : memref<2x4x256xf32, #tpu.memory_space<vmem>>, vector<1x4x16xf32>
    %72 = vector.shape_cast %71 : vector<1x4x16xf32> to vector<4x16xf32>
    %c0_80 = arith.constant 0 : index
    %c469 = arith.constant 469 : index
    %73 = vector.load %arg3[%c0_80, %c469] : memref<4x768xf32, #tpu.memory_space<vmem>>, vector<4x16xf32>
    tpu.vector_store %arg3[%c0_80, %c469], %72 {strides = array<i32>} : memref<4x768xf32, #tpu.memory_space<vmem>>, vector<4x16xf32>,
    %c1_81 = arith.constant 1 : index
    %c0_82 = arith.constant 0 : index
    %c128_83 = arith.constant 128 : index
    %74 = vector.load %arg0[%c1_81, %c0_82, %c128_83] : memref<2x4x256xf32, #tpu.memory_space<vmem>>, vector<1x4x16xf32>
    %75 = vector.shape_cast %74 : vector<1x4x16xf32> to vector<4x16xf32>
    %c0_84 = arith.constant 0 : index
    %c487 = arith.constant 487 : index
    %76 = vector.load %arg3[%c0_84, %c487] : memref<4x768xf32, #tpu.memory_space<vmem>>, vector<4x16xf32>
    tpu.vector_store %arg3[%c0_84, %c487], %75 {strides = array<i32>} : memref<4x768xf32, #tpu.memory_space<vmem>>, vector<4x16xf32>,
    %c1_85 = arith.constant 1 : index
    %c0_86 = arith.constant 0 : index
    %c144_87 = arith.constant 144 : index
    %77 = vector.load %arg0[%c1_85, %c0_86, %c144_87] : memref<2x4x256xf32, #tpu.memory_space<vmem>>, vector<1x4x16xf32>
    %78 = vector.shape_cast %77 : vector<1x4x16xf32> to vector<4x16xf32>
    %c0_88 = arith.constant 0 : index
    %c505 = arith.constant 505 : index
    %79 = vector.load %arg3[%c0_88, %c505] : memref<4x768xf32, #tpu.memory_space<vmem>>, vector<4x16xf32>
    tpu.vector_store %arg3[%c0_88, %c505], %78 {strides = array<i32>} : memref<4x768xf32, #tpu.memory_space<vmem>>, vector<4x16xf32>,
    %c1_89 = arith.constant 1 : index
    %c0_90 = arith.constant 0 : index
    %c160_91 = arith.constant 160 : index
    %80 = vector.load %arg0[%c1_89, %c0_90, %c160_91] : memref<2x4x256xf32, #tpu.memory_space<vmem>>, vector<1x4x16xf32>
    %81 = vector.shape_cast %80 : vector<1x4x16xf32> to vector<4x16xf32>
    %c0_92 = arith.constant 0 : index
    %c523 = arith.constant 523 : index
    %82 = vector.load %arg3[%c0_92, %c523] : memref<4x768xf32, #tpu.memory_space<vmem>>, vector<4x16xf32>
    tpu.vector_store %arg3[%c0_92, %c523], %81 {strides = array<i32>} : memref<4x768xf32, #tpu.memory_space<vmem>>, vector<4x16xf32>,
    %c1_93 = arith.constant 1 : index
    %c0_94 = arith.constant 0 : index
    %c176_95 = arith.constant 176 : index
    %83 = vector.load %arg0[%c1_93, %c0_94, %c176_95] : memref<2x4x256xf32, #tpu.memory_space<vmem>>, vector<1x4x16xf32>
    %84 = vector.shape_cast %83 : vector<1x4x16xf32> to vector<4x16xf32>
    %c0_96 = arith.constant 0 : index
    %c541 = arith.constant 541 : index
    %85 = vector.load %arg3[%c0_96, %c541] : memref<4x768xf32, #tpu.memory_space<vmem>>, vector<4x16xf32>
    tpu.vector_store %arg3[%c0_96, %c541], %84 {strides = array<i32>} : memref<4x768xf32, #tpu.memory_space<vmem>>, vector<4x16xf32>,
    %c1_97 = arith.constant 1 : index
    %c0_98 = arith.constant 0 : index
    %c192_99 = arith.constant 192 : index
    %86 = vector.load %arg0[%c1_97, %c0_98, %c192_99] : memref<2x4x256xf32, #tpu.memory_space<vmem>>, vector<1x4x16xf32>
    %87 = vector.shape_cast %86 : vector<1x4x16xf32> to vector<4x16xf32>
    %c0_100 = arith.constant 0 : index
    %c559 = arith.constant 559 : index
    %88 = vector.load %arg3[%c0_100, %c559] : memref<4x768xf32, #tpu.memory_space<vmem>>, vector<4x16xf32>
    tpu.vector_store %arg3[%c0_100, %c559], %87 {strides = array<i32>} : memref<4x768xf32, #tpu.memory_space<vmem>>, vector<4x16xf32>,
    %c1_101 = arith.constant 1 : index
    %c0_102 = arith.constant 0 : index
    %c208_103 = arith.constant 208 : index
    %89 = vector.load %arg0[%c1_101, %c0_102, %c208_103] : memref<2x4x256xf32, #tpu.memory_space<vmem>>, vector<1x4x16xf32>
    %90 = vector.shape_cast %89 : vector<1x4x16xf32> to vector<4x16xf32>
    %c0_104 = arith.constant 0 : index
    %c577 = arith.constant 577 : index
    %91 = vector.load %arg3[%c0_104, %c577] : memref<4x768xf32, #tpu.memory_space<vmem>>, vector<4x16xf32>
    tpu.vector_store %arg3[%c0_104, %c577], %90 {strides = array<i32>} : memref<4x768xf32, #tpu.memory_space<vmem>>, vector<4x16xf32>,
    %c1_105 = arith.constant 1 : index
    %c0_106 = arith.constant 0 : index
    %c224_107 = arith.constant 224 : index
    %92 = vector.load %arg0[%c1_105, %c0_106, %c224_107] : memref<2x4x256xf32, #tpu.memory_space<vmem>>, vector<1x4x16xf32>
    %93 = vector.shape_cast %92 : vector<1x4x16xf32> to vector<4x16xf32>
    %c0_108 = arith.constant 0 : index
    %c595 = arith.constant 595 : index
    %94 = vector.load %arg3[%c0_108, %c595] : memref<4x768xf32, #tpu.memory_space<vmem>>, vector<4x16xf32>
    tpu.vector_store %arg3[%c0_108, %c595], %93 {strides = array<i32>} : memref<4x768xf32, #tpu.memory_space<vmem>>, vector<4x16xf32>,
    %c1_109 = arith.constant 1 : index
    %c0_110 = arith.constant 0 : index
    %c240_111 = arith.constant 240 : index
    %95 = vector.load %arg0[%c1_109, %c0_110, %c240_111] : memref<2x4x256xf32, #tpu.memory_space<vmem>>, vector<1x4x16xf32>
    %96 = vector.shape_cast %95 : vector<1x4x16xf32> to vector<4x16xf32>
    %c0_112 = arith.constant 0 : index
    %c613 = arith.constant 613 : index
    %97 = vector.load %arg3[%c0_112, %c613] : memref<4x768xf32, #tpu.memory_space<vmem>>, vector<4x16xf32>
    tpu.vector_store %arg3[%c0_112, %c613], %96 {strides = array<i32>} : memref<4x768xf32, #tpu.memory_space<vmem>>, vector<4x16xf32>,
    %c0_113 = arith.constant 0 : index
    %c0_114 = arith.constant 0 : index
    %98 = vector.load %arg3[%c0_113, %c0_114] : memref<4x768xf32, #tpu.memory_space<vmem>>, vector<4x640xf32>
    %c0_115 = arith.constant 0 : index
    %c0_116 = arith.constant 0 : index
    %99 = vector.load %arg4[%c0_115, %c0_116] : memref<36x640xf32, #tpu.memory_space<vmem>>, vector<4x640xf32>
    tpu.vector_store %arg4[%c0_115, %c0_116], %98 {strides = array<i32>} : memref<36x640xf32, #tpu.memory_space<vmem>>, vector<4x640xf32>,
    %c0_117 = arith.constant 0 : index
    %c1_118 = arith.constant 1 : index
    %100 = vector.load %arg3[%c0_117, %c1_118] : memref<4x768xf32, #tpu.memory_space<vmem>>, vector<4x640xf32>
    %c4 = arith.constant 4 : index
    %c0_119 = arith.constant 0 : index
    %101 = vector.load %arg4[%c4, %c0_119] : memref<36x640xf32, #tpu.memory_space<vmem>>, vector<4x640xf32>
    tpu.vector_store %arg4[%c4, %c0_119], %100 {strides = array<i32>} : memref<36x640xf32, #tpu.memory_space<vmem>>, vector<4x640xf32>,
    %c0_120 = arith.constant 0 : index
    %c2 = arith.constant 2 : index
    %102 = vector.load %arg3[%c0_120, %c2] : memref<4x768xf32, #tpu.memory_space<vmem>>, vector<4x640xf32>
    %c8 = arith.constant 8 : index
    %c0_121 = arith.constant 0 : index
    %103 = vector.load %arg4[%c8, %c0_121] : memref<36x640xf32, #tpu.memory_space<vmem>>, vector<4x640xf32>
    tpu.vector_store %arg4[%c8, %c0_121], %102 {strides = array<i32>} : memref<36x640xf32, #tpu.memory_space<vmem>>, vector<4x640xf32>,
    %c0_122 = arith.constant 0 : index
    %c18 = arith.constant 18 : index
    %104 = vector.load %arg3[%c0_122, %c18] : memref<4x768xf32, #tpu.memory_space<vmem>>, vector<4x640xf32>
    %c12 = arith.constant 12 : index
    %c0_123 = arith.constant 0 : index
    %105 = vector.load %arg4[%c12, %c0_123] : memref<36x640xf32, #tpu.memory_space<vmem>>, vector<4x640xf32>
    tpu.vector_store %arg4[%c12, %c0_123], %104 {strides = array<i32>} : memref<36x640xf32, #tpu.memory_space<vmem>>, vector<4x640xf32>,
    %c0_124 = arith.constant 0 : index
    %c19_125 = arith.constant 19 : index
    %106 = vector.load %arg3[%c0_124, %c19_125] : memref<4x768xf32, #tpu.memory_space<vmem>>, vector<4x640xf32>
    %c16_126 = arith.constant 16 : index
    %c0_127 = arith.constant 0 : index
    %107 = vector.load %arg4[%c16_126, %c0_127] : memref<36x640xf32, #tpu.memory_space<vmem>>, vector<4x640xf32>
    tpu.vector_store %arg4[%c16_126, %c0_127], %106 {strides = array<i32>} : memref<36x640xf32, #tpu.memory_space<vmem>>, vector<4x640xf32>,
    %c0_128 = arith.constant 0 : index
    %c20 = arith.constant 20 : index
    %108 = vector.load %arg3[%c0_128, %c20] : memref<4x768xf32, #tpu.memory_space<vmem>>, vector<4x640xf32>
    %c20_129 = arith.constant 20 : index
    %c0_130 = arith.constant 0 : index
    %109 = vector.load %arg4[%c20_129, %c0_130] : memref<36x640xf32, #tpu.memory_space<vmem>>, vector<4x640xf32>
    tpu.vector_store %arg4[%c20_129, %c0_130], %108 {strides = array<i32>} : memref<36x640xf32, #tpu.memory_space<vmem>>, vector<4x640xf32>,
    %c0_131 = arith.constant 0 : index
    %c36 = arith.constant 36 : index
    %110 = vector.load %arg3[%c0_131, %c36] : memref<4x768xf32, #tpu.memory_space<vmem>>, vector<4x640xf32>
    %c24 = arith.constant 24 : index
    %c0_132 = arith.constant 0 : index
    %111 = vector.load %arg4[%c24, %c0_132] : memref<36x640xf32, #tpu.memory_space<vmem>>, vector<4x640xf32>
    tpu.vector_store %arg4[%c24, %c0_132], %110 {strides = array<i32>} : memref<36x640xf32, #tpu.memory_space<vmem>>, vector<4x640xf32>,
    %c0_133 = arith.constant 0 : index
    %c37_134 = arith.constant 37 : index
    %112 = vector.load %arg3[%c0_133, %c37_134] : memref<4x768xf32, #tpu.memory_space<vmem>>, vector<4x640xf32>
    %c28 = arith.constant 28 : index
    %c0_135 = arith.constant 0 : index
    %113 = vector.load %arg4[%c28, %c0_135] : memref<36x640xf32, #tpu.memory_space<vmem>>, vector<4x640xf32>
    tpu.vector_store %arg4[%c28, %c0_135], %112 {strides = array<i32>} : memref<36x640xf32, #tpu.memory_space<vmem>>, vector<4x640xf32>,
    %c0_136 = arith.constant 0 : index
    %c38 = arith.constant 38 : index
    %114 = vector.load %arg3[%c0_136, %c38] : memref<4x768xf32, #tpu.memory_space<vmem>>, vector<4x640xf32>
    %c32_137 = arith.constant 32 : index
    %c0_138 = arith.constant 0 : index
    %115 = vector.load %arg4[%c32_137, %c0_138] : memref<36x640xf32, #tpu.memory_space<vmem>>, vector<4x640xf32>
    tpu.vector_store %arg4[%c32_137, %c0_138], %114 {strides = array<i32>} : memref<36x640xf32, #tpu.memory_space<vmem>>, vector<4x640xf32>,
    %c0_139 = arith.constant 0 : index
    %c896 = arith.constant 896 : index
    %116 = vector.load %arg1[%c0_139, %c896] : memref<8x1024xf32, #tpu.memory_space<vmem>>, vector<8x36xf32>
    %c0_140 = arith.constant 0 : index
    %c932 = arith.constant 932 : index
    %117 = vector.load %arg1[%c0_140, %c932] : memref<8x1024xf32, #tpu.memory_space<vmem>>, vector<8x1xf32>
    %c0_141 = arith.constant 0 : index
    %c0_142 = arith.constant 0 : index
    %118 = vector.load %arg4[%c0_141, %c0_142] : memref<36x640xf32, #tpu.memory_space<vmem>>, vector<36x640xf32>
    %cst_143 = arith.constant dense<0.000000e+00> : vector<8x640xf32>
    %119 = tpu.matmul %116, %118, %cst_143 {dimension_numbers = #tpu.dot_dimension_numbers<[1], [0], [0], [1], [0, 0, 1, 1], [], []>} : vector<8x36xf32>, vector<36x640xf32>, vector<8x640xf32> -> vector<8x640xf32>
    %120 = vector.broadcast %117 : vector<8x1xf32> to vector<8x640xf32>
    %121 = arith.addf %119, %120 : vector<8x640xf32>
    %cst_144 = arith.constant 0.000000e+00 : f32
    %122 = vector.broadcast %cst_144 : f32 to vector<8x640xf32>
    %123 = arith.maximumf %121, %122 : vector<8x640xf32>
    %c0_145 = arith.constant 0 : index
    %c0_146 = arith.constant 0 : index
    %124 = vector.load %arg1[%c0_145, %c0_146] : memref<8x1024xf32, #tpu.memory_space<vmem>>, vector<2x640xf32>
    %cst_147 = arith.constant dense<0.000000e+00> : vector<2x8xf32>
    %125 = tpu.matmul %124, %123, %cst_147 {dimension_numbers = #tpu.dot_dimension_numbers<[1], [1], [0], [0], [0, 0, 1, 0], [], []>} : vector<2x640xf32>, vector<8x640xf32>, vector<2x8xf32> -> vector<2x8xf32>
    %c0_148 = arith.constant 0 : index
    %c640 = arith.constant 640 : index
    %126 = vector.load %arg1[%c0_148, %c640] : memref<8x1024xf32, #tpu.memory_space<vmem>>, vector<8x128xf32>
    %c0_149 = arith.constant 0 : index
    %c768 = arith.constant 768 : index
    %127 = vector.load %arg1[%c0_149, %c768] : memref<8x1024xf32, #tpu.memory_space<vmem>>, vector<1x128xf32>
    %cst_150 = arith.constant dense<0.000000e+00> : vector<2x128xf32>
    %128 = tpu.matmul %125, %126, %cst_150 {dimension_numbers = #tpu.dot_dimension_numbers<[1], [0], [0], [1], [0, 0, 1, 1], [], []>} : vector<2x8xf32>, vector<8x128xf32>, vector<2x128xf32> -> vector<2x128xf32>
    %129 = vector.broadcast %127 : vector<1x128xf32> to vector<2x128xf32>
    %130 = arith.addf %128, %129 : vector<2x128xf32>
    %c0_151 = arith.constant 0 : index
    %c0_152 = arith.constant 0 : index
    %131 = vector.load %arg2[%c0_151, %c0_152] : memref<2x128xf32, #tpu.memory_space<vmem>>, vector<2x128xf32>
    tpu.vector_store %arg2[%c0_151, %c0_152], %130 {strides = array<i32>} : memref<2x128xf32, #tpu.memory_space<vmem>>, vector<2x128xf32>,
    return
  }
}

</mosaic_0001>

<bundles_post_ra>
// kernel: model_wrapper_forward.1
= control target key start
LH: loop header
LB: loop body
LE: loop exit
PB: predicated region body
PF: predicated region fallthrough
CT: control target
= control target key end

     0   :  { %v1264_v2 = vmov 0.0   ;;  %s1265_s13 = smov 23   ;;  %s1266_s14 = smov 19   ;;  %vm19_vm0 = vcmask 281752   ;;  %vm26_vm1 = vcmask 429352   ;;  %vm33_vm2 = vcmask 576952   ;;  %s1606_s0 = inlined_call_operand.vmem [shape: f32[2,4,256], index: 0, kind: input, shape index: {}]   ;;  %s1607_s1 = inlined_call_operand.vmem [shape: f32[8,1024], index: 1, kind: input, shape index: {}]   ;;  %s1608_s2 = inlined_call_operand.vmem [shape: f32[2,128], index: 2, kind: output, shape index: {}]  }
   0x1   :  { %v28_v0 = vld [vmem:[%s1606_s0] sm:$0xf]  ;;  %11 = vst [vmem:[#allocation2] sm:$0xff] %v1264_v2  ;;  %12 = vst [vmem:[#allocation2 + $0x8] sm:$0xff] %v1264_v2  ;;  %682 = vmatprep.mubr.f32.mxu0 %v1264_v2  ;;  %753 = vmatprep.mubr.f32.mxu1 %v1264_v2  ;;  %s1267_s19 = smov 25   ;;  %s1268_s20 = smov 21  }
   0x2   :  { %v14_v1 = vld [vmem:[%s1606_s0] sm:$0xf]  ;;  %13 = vst [vmem:[#allocation2 + $0x10] sm:$0xff] %v1264_v2  ;;  %30 = vrot.lane.b32.xlu1 %v28_v0, %s1265_s13  ;;  %s1269_s25 = smov 27   ;;  %s1270_s26 = smov 31   ;;  %vm40_vm3 = vcmask 724552  }
   0x3   :  { %16 = vrot.lane.b32.xlu0 %v14_v1, %s1266_s14  ;;  %v35_v3 = vld [vmem:[%s1606_s0] sm:$0xf]  ;;  %s1271_s3 = smov 33   ;;  %s1272_s4 = smov 29   ;;  %v82_v9 = vld [vmem:[%s1606_s0 + $0x4] sm:$0xf] }
   0x4   :  { %v21_v4 = vld [vmem:[%s1606_s0] sm:$0xf]  ;;  %v75_v10 = vld [vmem:[%s1606_s0 + $0x4] sm:$0xf]  ;;  %s1273_s9 = smov 37   ;;  %s1274_s10 = smov 35  }
   0x5   :  { %v42_v5 = vld [vmem:[%s1606_s0] sm:$0xf]  ;;  %v110_v11 = vld [vmem:[%s1606_s0 + $0x4] sm:$0xf]  ;;  %s1275_s15 = smov 45   ;;  %s1276_s16 = smov 39  }
   0x6   :  { %37 = vrot.lane.b32.xlu1 %v35_v3, %s1267_s19  ;;  %v56_v6 = vld [vmem:[%s1606_s0] sm:$0xf]  ;;  %v89_v12 = vld [vmem:[%s1606_s0 + $0x4] sm:$0xf]  ;;  %s1277_s21 = smov 41   ;;  %s1278_s22 = smov 43  }
   0x7   :  { %23 = vrot.lane.b32.xlu0 %v21_v4, %s1268_s20  ;;  %v68_v7 = vld [vmem:[%s1606_s0] sm:$0xf]  ;;  %v96_v13 = vld [vmem:[%s1606_s0 + $0x4] sm:$0xf]  ;;  %s1279_s27 = smov 47   ;;  %s1280_s28 = smov 49  }
   0x8   :  { %v49_v8 = vld [vmem:[%s1606_s0] sm:$0xf]  ;;  %v103_v14 = vld [vmem:[%s1606_s0 + $0x4] sm:$0xf]  ;;  %v1133_v17 = vld [vmem:[%s1606_s0 + $0x8] sm:$0xf] }
   0x9   :  { %v122_v15 = vld [vmem:[%s1606_s0 + $0x4] sm:$0xf]  ;;  %v1131_v18 = vld [vmem:[%s1606_s0 + $0x8] sm:$0xf]  ;;  %s1281_s5 = smov 91   ;;  %s1282_s6 = smov 87  }
   0xa   :  { %44 = vrot.lane.b32.xlu1 %v42_v5, %s1269_s25  ;;  %v129_v16 = vld [vmem:[%s1606_s0 + $0x4] sm:$0xf]  ;;  %v1132_v19 = vld [vmem:[%s1606_s0 + $0x8] sm:$0xf]  ;;  %s1283_s11 = smov 89   ;;  %s1284_s12 = smov 93  }
   0xb   :  { %58 = vrot.lane.b32.xlu0 %v56_v6, %s1270_s26  ;;  %v1134_v20 = vld [vmem:[%s1606_s0 + $0x8] sm:$0xf]  ;;  %s1285_s17 = smov 95   ;;  %s1286_s18 = smov 97   ;;  %v1140_v24 = vld [vmem:[%s1606_s0 + $0xc] sm:$0xf] }
   0xc   :  { %v1135_v21 = vld [vmem:[%s1606_s0 + $0x8] sm:$0xf]  ;;  %s1287_s23 = smov 99   ;;  %s1288_s24 = smov 105   ;;  %v1139_v26 = vld [vmem:[%s1606_s0 + $0xc] sm:$0xf] }
   0xd   :  { %v1136_v22 = vld [vmem:[%s1606_s0 + $0x8] sm:$0xf]  ;;  %s1289_s29 = smov 101   ;;  %s1290_s30 = smov 103   ;;  %v1141_v27 = vld [vmem:[%s1606_s0 + $0xc] sm:$0xf] }
   0xe   :  { %70 = vrot.lane.b32.xlu1 %v68_v7, %s1271_s3  ;;  %v1137_v23 = vld [vmem:[%s1606_s0 + $0x8] sm:$0xf]  ;;  %v1142_v28 = vld [vmem:[%s1606_s0 + $0xc] sm:$0xf]  ;;  %s1291_s8 = smov 107   ;;  %s1293_s14 = smov 111  }
   0xf   :  { %51 = vrot.lane.b32.xlu0 %v49_v8, %s1272_s4  ;;  %v1138_v25 = vld [vmem:[%s1606_s0 + $0x8] sm:$0xf]  ;;  %v1143_v29 = vld [vmem:[%s1606_s0 + $0xc] sm:$0xf]  ;;  %s1295_s20 = smov 115   ;;  %vm47_vm4 = vcmask 872152  }
  0x10   :  { %v1144_v30 = vld [vmem:[%s1606_s0 + $0xc] sm:$0xf]  ;;  %vm64_vm5 = vcmask 1044472   ;;  %vm65_vm6 = vcmask 121860   ;;  %vm61_vm7 = vcmask 252928   ;;  %vm54_vm8 = vcmask 1019752  }
  0x11   :  { %v1145_v31 = vld [vmem:[%s1606_s0 + $0xc] sm:$0xf]  ;;  %vm66_vm9 = vmor %vm65_vm6, %vm64_vm5  ;;  %vm73_vm10 = vcmask 265352   ;;  %vm80_vm11 = vcmask 412952   ;;  %vm87_vm12 = vcmask 560552   ;;  %vm94_vm13 = vcmask 708152  }
  0x12   :  { %84 = vrot.lane.b32.xlu1 %v82_v9, %s1273_s9  ;;  %s1292_s9 = smov 109   ;;  %v1146_v32 = vld [vmem:[%s1606_s0 + $0xc] sm:$0xf]  ;;  %vm118_vm14 = vcmask 1044456   ;;  %vm119_vm15 = vcmask 105476   ;;  %vm134_vm5 = vcmask 396552  }
  0x13   :  { %77 = vrot.lane.b32.xlu0 %v75_v10, %s1274_s10  ;;  %vm142_vm6 = vcmask 839352   ;;  %s1297_s0 = smov 126   ;;  %s1301_s25 = smov 92  }
  0x14   :  { %s1302_s26 = smov 90  }
  0x16   :  { %112 = vrot.lane.b32.xlu1 %v110_v11, %s1275_s15  ;;  %s1294_s15 = smov 113  }
  0x17   :  { %91 = vrot.lane.b32.xlu0 %v89_v12, %s1276_s16 }
  0x1a   :  { %105 = vrot.lane.b32.xlu1 %v103_v14, %s1278_s22  ;;  %s1298_s22 = smov 127  }
  0x1b   :  { %98 = vrot.lane.b32.xlu0 %v96_v13, %s1277_s21  ;;  %s1296_s21 = smov 117  }
  0x1e   :  { %131 = vrot.lane.b32.xlu1 %v129_v16, %s1280_s28 }
  0x1f   :  { %124 = vrot.lane.b32.xlu0 %v122_v15, %s1279_s27 }
  0x22   :  { %139 = vrot.lane.b32.xlu1 %v1131_v18, %s1282_s6 }
  0x23   :  { %153 = vrot.lane.b32.xlu0 %v1133_v17, %s1281_s5 }
  0x26   :  { %165 = vrot.lane.b32.xlu1 %v1134_v20, %s1284_s12  ;;  %v1483_v20 = vld [vmem:[%s1607_s1 + $0x38] sm:$0xff] }
  0x27   :  { %146 = vrot.lane.b32.xlu0 %v1132_v19, %s1283_s11 }
  0x2a   :  { %179 = vrot.lane.b32.xlu1 %v1136_v22, %s1286_s18 }
  0x2b   :  { %172 = vrot.lane.b32.xlu0 %v1135_v21, %s1285_s17  ;;  %v1303_v21 = vmov 36  }
  0x2c   :  { %1257 = vset.pattern.permute.xlu0 %v1303_v21 }
  0x2e   :  { %207 = vrot.lane.b32.xlu1 %v1140_v24, %s1288_s24  ;;  %s1300_s24 = smov 110  }
  0x2f   :  { %186 = vrot.lane.b32.xlu0 %v1137_v23, %s1287_s23  ;;  %s1299_s23 = smov 108  }
  0x32   :  { %200 = vrot.lane.b32.xlu1 %v1139_v26, %s1290_s30 }
  0x33   :  { %193 = vrot.lane.b32.xlu0 %v1138_v25, %s1289_s29 }
  0x36   :  { %226 = vrot.lane.b32.xlu1 %v1142_v28, %s1292_s9 }
  0x37   :  { %219 = vrot.lane.b32.xlu0 %v1141_v27, %s1291_s8 }
  0x3a   :  { %240 = vrot.lane.b32.xlu1 %v1144_v30, %s1294_s15 }
  0x3b   :  { %233 = vrot.lane.b32.xlu0 %v1143_v29, %s1293_s14 }
  0x3e   :  { %254 = vrot.lane.b32.xlu1 %v1146_v32, %s1296_s21 }
  0x3f   :  { %247 = vrot.lane.b32.xlu0 %v1145_v31, %s1295_s20 }
  0x74   :  { %v31_v33 = vpop.permute.xlu1 %30 }
  0x75   :  { %v17_v34 = vpop.permute.xlu0 %16 }
  0x76   :  { %20 = vst.msk [vmem:[#allocation2] sm:$0xf] %vm19_vm0, %v17_v34  ;;  %vm101_vm0 = vcmask 855752  }
  0x78   :  { %v38_v35 = vpop.permute.xlu1 %37 }
  0x79   :  { %v24_v36 = vpop.permute.xlu0 %23 }
  0x7a   :  { %27 = vst.msk [vmem:[#allocation2] sm:$0xf] %vm26_vm1, %v24_v36  ;;  %vm115_vm1 = vcmask 367616  }
  0x7b   :  { %34 = vst.msk [vmem:[#allocation2] sm:$0xf] %vm33_vm2, %v31_v33  ;;  %vm108_vm2 = vcmask 1003352  }
  0x7c   :  { %41 = vst.msk [vmem:[#allocation2] sm:$0xf] %vm40_vm3, %v38_v35  ;;  %v45_v37 = vpop.permute.xlu1 %44  ;;  %vm120_vm3 = vmor %vm119_vm15, %vm118_vm14  ;;  %vm182_vm14 = vcmask 527752   ;;  %vm189_vm15 = vcmask 675352  }
  0x7d   :  { %v59_v38 = vpop.permute.xlu0 %58  ;;  %48 = vst.msk [vmem:[#allocation2] sm:$0xf] %vm47_vm4, %v45_v37  ;;  %vm127_vm4 = vcmask 248952  }
  0x7e   :  { %v60_v39 = vrot.slane %v59_v38, 4 }
  0x80   :  { %v71_v40 = vpop.permute.xlu1 %70  ;;  %v62_v42 = vsel %vm61_vm7, %v60_v39, %v59_v38  ;;  %vm156_vm7 = vcmask 744448  }
  0x81   :  { %v52_v41 = vpop.permute.xlu0 %51 }
  0x82   :  { %55 = vst.msk [vmem:[#allocation2] sm:$0xf] %vm54_vm8, %v52_v41  ;;  %vm159_vm8 = vcmask 1044440  }
  0x83   :  { %67 = vst.msk [vmem:[#allocation2] sm:$0xff] %vm66_vm9, %v62_v42  ;;  %vm160_vm9 = vcmask 89092  }
  0x84   :  { %74 = vst.msk [vmem:[#allocation2 + $0x4] sm:$0xf] %vm73_vm10, %v71_v40  ;;  %v85_v43 = vpop.permute.xlu1 %84  ;;  %vm149_vm10 = vcmask 986952  }
  0x85   :  { %v78_v44 = vpop.permute.xlu0 %77 }
  0x86   :  { %81 = vst.msk [vmem:[#allocation2 + $0x4] sm:$0xf] %vm80_vm11, %v78_v44  ;;  %vm161_vm11 = vmor %vm160_vm9, %vm159_vm8  ;;  %vm229_vm8 = vcmask 363752   ;;  %vm236_vm9 = vcmask 511352  }
  0x87   :  { %88 = vst.msk [vmem:[#allocation2 + $0x4] sm:$0xf] %vm87_vm12, %v85_v43  ;;  %vm168_vm12 = vcmask 232552  }
  0x88   :  { %v113_v45 = vpop.permute.xlu1 %112 }
  0x89   :  { %v92_v46 = vpop.permute.xlu0 %91  ;;  %v114_v47 = vrot.slane %v113_v45, 4 }
  0x8a   :  { %95 = vst.msk [vmem:[#allocation2 + $0x4] sm:$0xf] %vm94_vm13, %v92_v46  ;;  %vm175_vm13 = vcmask 380152  }
  0x8b   :  { %v116_v50 = vsel %vm115_vm1, %v114_v47, %v113_v45  ;;  %vm213_vm1 = vcmask 1044424  }
  0x8c   :  { %v106_v49 = vpop.permute.xlu1 %105 }
  0x8d   :  { %v99_v48 = vpop.permute.xlu0 %98 }
  0x8e   :  { %102 = vst.msk [vmem:[#allocation2 + $0x4] sm:$0xf] %vm101_vm0, %v99_v48  ;;  %vm210_vm0 = vcmask 859136  }
  0x8f   :  { %109 = vst.msk [vmem:[#allocation2 + $0x4] sm:$0xf] %vm108_vm2, %v106_v49  ;;  %vm214_vm2 = vcmask 72708  }
  0x90   :  { %121 = vst.msk [vmem:[#allocation2 + $0x4] sm:$0xff] %vm120_vm3, %v116_v50  ;;  %v132_v52 = vpop.permute.xlu1 %131  ;;  %vm196_vm3 = vcmask 822952  }
  0x91   :  { %v125_v51 = vpop.permute.xlu0 %124 }
  0x92   :  { %128 = vst.msk [vmem:[#allocation2 + $0x8] sm:$0xf] %vm127_vm4, %v125_v51  ;;  %vm203_vm4 = vcmask 970552  }
  0x93   :  { %135 = vst.msk [vmem:[#allocation2 + $0x8] sm:$0xf] %vm134_vm5, %v132_v52  ;;  %vm215_vm5 = vmor %vm214_vm2, %vm213_vm1  ;;  %vm405_vm1 = vcmask 891904   ;;  %vm479_vm2 = vcmask 752640  }
  0x94   :  { %v140_v54 = vpop.permute.xlu1 %139 }
  0x95   :  { %v154_v53 = vpop.permute.xlu0 %153  ;;  %143 = vst.msk [vmem:[#allocation2 + $0x8] sm:$0xf] %vm142_vm6, %v140_v54  ;;  %vm222_vm6 = vcmask 216152  }
  0x96   :  { %v155_v55 = vrot.slane %v154_v53, 4 }
  0x97   :  { %v310_v56 = vld [vmem:[#allocation2] sm:$0xff] }
  0x98   :  { %v157_v57 = vsel %vm156_vm7, %v155_v55, %v154_v53  ;;  %319 = vrot.lane.b32.xlu1 %v310_v56, %s1297_s0  ;;  %v1426_v58 = vcombine.high %v310_v56, %v310_v56  ;;  %284 = vrot.lane.b32.xlu0 %v310_v56, %s1298_s22  ;;  %268 = vst [vmem:[#allocation3] sm:$0xf] %v310_v56  ;;  %v166_v60 = vpop.permute.xlu1 %165 }
  0x99   :  { %v147_v59 = vpop.permute.xlu0 %146  ;;  %v279_v1 = vcombine.low %v310_v56, %v310_v56 }
  0x9a   :  { %150 = vst.msk [vmem:[#allocation2 + $0x8] sm:$0xf] %vm149_vm10, %v147_v59  ;;  %269 = vst [vmem:[#allocation3 + $0x8] sm:$0xf] %v1426_v58  ;;  %vm243_vm10 = vcmask 658952  }
  0x9b   :  { %162 = vst.msk [vmem:[#allocation2 + $0x8] sm:$0xff] %vm161_vm11, %v157_v57  ;;  %vm250_vm11 = vcmask 806552  }
  0x9c   :  { %169 = vst.msk [vmem:[#allocation2 + $0xc] sm:$0xf] %vm168_vm12, %v166_v60  ;;  %432 = vrot.lane.b32.xlu1 %v310_v56, %s1299_s23  ;;  %358 = vrot.lane.b32.xlu0 %v310_v56, %s1300_s24  ;;  %v180_v62 = vpop.permute.xlu1 %179  ;;  %vm257_vm12 = vcmask 954152  }
  0x9d   :  { %v173_v61 = vpop.permute.xlu0 %172 }
  0x9e   :  { %176 = vst.msk [vmem:[#allocation2 + $0xc] sm:$0xf] %vm175_vm13, %v173_v61  ;;  %vm331_vm13 = vcmask 1031168  }
  0x9f   :  { %183 = vst.msk [vmem:[#allocation2 + $0xc] sm:$0xf] %vm182_vm14, %v180_v62  ;;  %vm294_vm14 = vcmask 1039360  }
  0xa0   :  { %506 = vrot.lane.b32.xlu1 %v310_v56, %s1281_s5  ;;  %321 = vrot.lane.b32.xlu0 %v1426_v58, %s1297_s0  ;;  %v208_v0 = vpop.permute.xlu1 %207 }
  0xa1   :  { %v187_v63 = vpop.permute.xlu0 %186  ;;  %v209_v3 = vrot.slane %v208_v0, 4 }
  0xa2   :  { %190 = vst.msk [vmem:[#allocation2 + $0xc] sm:$0xf] %vm189_vm15, %v187_v63  ;;  %vm368_vm15 = vcmask 900096  }
  0xa3   :  { %v211_v4 = vsel %vm210_vm0, %v209_v3, %v208_v0  ;;  %vm442_vm0 = vcmask 883712  }
  0xa4   :  { %393 = vrot.lane.b32.xlu1 %v310_v56, %s1292_s9  ;;  %282 = vrot.lane.b32.xlu0 %v279_v1, %s1298_s22  ;;  %v201_v6 = vpop.permute.xlu1 %200 }
  0xa5   :  { %v194_v5 = vpop.permute.xlu0 %193 }
  0xa6   :  { %197 = vst.msk [vmem:[#allocation2 + $0xc] sm:$0xf] %vm196_vm3, %v194_v5  ;;  %vm552_vm3 = vcmask 736256  }
  0xa7   :  { %204 = vst.msk [vmem:[#allocation2 + $0xc] sm:$0xf] %vm203_vm4, %v201_v6  ;;  %vm602_vm4 = vcmask 1043456  }
  0xa8   :  { %216 = vst.msk [vmem:[#allocation2 + $0xc] sm:$0xff] %vm215_vm5, %v211_v4  ;;  %467 = vrot.lane.b32.xlu1 %v310_v56, %s1301_s25  ;;  %356 = vrot.lane.b32.xlu0 %v279_v1, %s1300_s24  ;;  %v227_v8 = vpop.permute.xlu1 %226  ;;  %vm599_vm5 = vcmask 293888  }
  0xa9   :  { %v220_v7 = vpop.permute.xlu0 %219 }
  0xaa   :  { %223 = vst.msk [vmem:[#allocation2 + $0x10] sm:$0xf] %vm222_vm6, %v220_v7  ;;  %vm1305_vm6 = vmmov 0  }
  0xab   :  { %230 = vst.msk [vmem:[#allocation2 + $0x10] sm:$0xf] %vm229_vm8, %v227_v8 }
  0xac   :  { %540 = vrot.lane.b32.xlu1 %v310_v56, %s1302_s26  ;;  %430 = vrot.lane.b32.xlu0 %v279_v1, %s1299_s23  ;;  %v241_v10 = vpop.permute.xlu1 %240 }
  0xad   :  { %v234_v9 = vpop.permute.xlu0 %233 }
  0xae   :  { %237 = vst.msk [vmem:[#allocation2 + $0x10] sm:$0xf] %vm236_vm9, %v234_v9 }
  0xaf   :  { %v385_v11 = vld [vmem:[#allocation2 + $0x8] sm:$0xff]  ;;  %244 = vst.msk [vmem:[#allocation2 + $0x10] sm:$0xf] %vm243_vm10, %v241_v10 }
  0xb0   :  { %395 = vrot.lane.b32.xlu1 %v1426_v58, %s1292_s9  ;;  %504 = vrot.lane.b32.xlu0 %v279_v1, %s1281_s5  ;;  %v391_v12 = vcombine.high %v385_v11, %v385_v11  ;;  %270 = vst [vmem:[#allocation3 + $0x10] sm:$0xf] %v385_v11  ;;  %v255_v14 = vpop.permute.xlu1 %254  ;;  %v428_v16 = vcombine.low %v385_v11, %v385_v11 }
  0xb1   :  { %v248_v13 = vpop.permute.xlu0 %247 }
  0xb2   :  { %251 = vst.msk [vmem:[#allocation2 + $0x10] sm:$0xf] %vm250_vm11, %v248_v13  ;;  %271 = vst [vmem:[#allocation3 + $0x18] sm:$0xf] %v391_v12 }
  0xb3   :  { %258 = vst.msk [vmem:[#allocation2 + $0x10] sm:$0xf] %vm257_vm12, %v255_v14 }
  0xb4   :  { %469 = vrot.lane.b32.xlu1 %v1426_v58, %s1301_s25  ;;  %397 = vrot.lane.b32.xlu0 %v385_v11, %s1292_s9 }
  0xb8   :  { %542 = vrot.lane.b32.xlu1 %v1426_v58, %s1302_s26  ;;  %471 = vrot.lane.b32.xlu0 %v385_v11, %s1301_s25 }
  0xba   :  { %v261_v15 = vld [vmem:[#allocation2 + $0x10] sm:$0xf] }
  0xbb   :  { %272 = vst [vmem:[#allocation3 + $0x20] sm:$0xf] %v261_v15  ;;  %v386_v17 = vld [vmem:[#allocation2 + $0x10] sm:$0xff] }
  0xbc   :  { %544 = vrot.lane.b32.xlu0 %v385_v11, %s1302_s26  ;;  %323 = vrot.lane.b32.xlu1 %v385_v11, %s1297_s0  ;;  %v429_v18 = vcombine.low %v386_v17, %v386_v17  ;;  %v392_v19 = vcombine.high %v386_v17, %v386_v17 }
  0xc0   :  { %436 = vrot.lane.b32.xlu0 %v385_v11, %s1299_s23  ;;  %288 = vrot.lane.b32.xlu1 %v385_v11, %s1298_s22 }
  0xc4   :  { %510 = vrot.lane.b32.xlu0 %v385_v11, %s1281_s5  ;;  %362 = vrot.lane.b32.xlu1 %v385_v11, %s1300_s24 }
  0xc8   :  { %434 = vrot.lane.b32.xlu0 %v428_v16, %s1299_s23  ;;  %286 = vrot.lane.b32.xlu1 %v428_v16, %s1298_s22 }
  0xcc   :  { %508 = vrot.lane.b32.xlu0 %v428_v16, %s1281_s5  ;;  %360 = vrot.lane.b32.xlu1 %v428_v16, %s1300_s24 }
  0xd0   :  { %399 = vrot.lane.b32.xlu0 %v391_v12, %s1292_s9  ;;  %325 = vrot.lane.b32.xlu1 %v391_v12, %s1297_s0 }
  0xd4   :  { %473 = vrot.lane.b32.xlu0 %v391_v12, %s1301_s25  ;;  %401 = vrot.lane.b32.xlu1 %v386_v17, %s1292_s9 }
  0xd8   :  { %546 = vrot.lane.b32.xlu0 %v391_v12, %s1302_s26  ;;  %475 = vrot.lane.b32.xlu1 %v386_v17, %s1301_s25 }
  0xdc   :  { %548 = vrot.lane.b32.xlu1 %v386_v17, %s1302_s26  ;;  %327 = vrot.lane.b32.xlu0 %v386_v17, %s1297_s0 }
  0xe0   :  { %438 = vrot.lane.b32.xlu1 %v429_v18, %s1299_s23  ;;  %290 = vrot.lane.b32.xlu0 %v429_v18, %s1298_s22 }
  0xe4   :  { %512 = vrot.lane.b32.xlu1 %v429_v18, %s1281_s5  ;;  %364 = vrot.lane.b32.xlu0 %v429_v18, %s1300_s24 }
  0xe8   :  { %329 = vrot.lane.b32.xlu1 %v392_v19, %s1297_s0  ;;  %292 = vrot.lane.b32.xlu0 %v386_v17, %s1298_s22 }
  0xec   :  { %403 = vrot.lane.b32.xlu1 %v392_v19, %s1292_s9  ;;  %366 = vrot.lane.b32.xlu0 %v386_v17, %s1300_s24 }
  0xf0   :  { %477 = vrot.lane.b32.xlu1 %v392_v19, %s1301_s25  ;;  %440 = vrot.lane.b32.xlu0 %v386_v17, %s1299_s23 }
  0xf4   :  { %550 = vrot.lane.b32.xlu1 %v392_v19, %s1302_s26  ;;  %514 = vrot.lane.b32.xlu0 %v386_v17, %s1281_s5 }
  0xf8   :  { %596 = vperm.xlu0 %1257, %v1483_v20  }
 0x10a   :  { %v320_v22 = vpop.permute.xlu1 %319  ;;  %v285_v23 = vpop.permute.xlu0 %284 }
 0x10e   :  { %v433_v24 = vpop.permute.xlu1 %432  ;;  %v1486_v25 = vpop.permute.xlu0 %358 }
 0x112   :  { %v1488_v26 = vpop.permute.xlu1 %506  ;;  %v322_v27 = vpop.permute.xlu0 %321 }
 0x113   :  { %v332_v28 = vsel %vm331_vm13, %v320_v22, %v322_v27 }
 0x114   :  { %342 = vst [vmem:[#allocation3 + $0x28] sm:$0xf] %v332_v28 }
 0x116   :  { %v394_v29 = vpop.permute.xlu1 %393  ;;  %v283_v30 = vpop.permute.xlu0 %282 }
 0x117   :  { %v295_v31 = vsel %vm294_vm14, %v283_v30, %v285_v23 }
 0x118   :  { %305 = vst [vmem:[#allocation3] sm:$0xf0] %v295_v31 }
 0x11a   :  { %v468_v32 = vpop.permute.xlu1 %467  ;;  %v357_v33 = vpop.permute.xlu0 %356 }
 0x11b   :  { %v369_v34 = vsel %vm368_vm15, %v357_v33, %v1486_v25 }
 0x11c   :  { %379 = vst [vmem:[#allocation3 + $0x28] sm:$0xf0] %v369_v34 }
 0x11e   :  { %v541_v35 = vpop.permute.xlu1 %540  ;;  %v431_v36 = vpop.permute.xlu0 %430 }
 0x11f   :  { %v443_v37 = vsel %vm442_vm0, %v431_v36, %v433_v24  ;;  %v569_v21 = vld [vmem:[#allocation3] sm:$0xff] }
 0x120   :  { %453 = vst [vmem:[#allocation3 + $0x50] sm:$0xf0] %v443_v37 }
 0x122   :  { %v396_v38 = vpop.permute.xlu1 %395  ;;  %v505_v39 = vpop.permute.xlu0 %504 }
 0x123   :  { %v406_v40 = vsel %vm405_vm1, %v394_v29, %v396_v38  ;;  %v516_v41 = vsel %vm156_vm7, %v505_v39, %v1488_v26  ;;  %v574_v13 = vld [vmem:[#allocation3 + $0x28] sm:$0xff] }
 0x124   :  { %416 = vst [vmem:[#allocation3 + $0x50] sm:$0xf] %v406_v40  ;;  %526 = vst [vmem:[#allocation3 + $0x78] sm:$0xf0] %v516_v41  ;;  %v1191_v22 = vpack.c.bf16 %v574_v13, %v569_v21 }
 0x126   :  { %v470_v42 = vpop.permute.xlu1 %469  ;;  %v398_v43 = vpop.permute.xlu0 %397 }
 0x127   :  { %v480_v44 = vsel %vm479_vm2, %v468_v32, %v470_v42  ;;  %v407_v45 = vsel %vm405_vm1, %v396_v38, %v398_v43 }
 0x128   :  { %490 = vst [vmem:[#allocation3 + $0x78] sm:$0xf] %v480_v44  ;;  %417 = vst [vmem:[#allocation3 + $0x58] sm:$0xf] %v407_v45 }
 0x12a   :  { %v543_v46 = vpop.permute.xlu1 %542  ;;  %v472_v47 = vpop.permute.xlu0 %471 }
 0x12b   :  { %v553_v48 = vsel %vm552_vm3, %v541_v35, %v543_v46  ;;  %v481_v49 = vsel %vm479_vm2, %v470_v42, %v472_v47  ;;  %v579_v30 = vld [vmem:[#allocation3 + $0x50] sm:$0xff]  ;;  %v1304_v42 = vmov 0.0|0.0  }
 0x12c   :  { %563 = vst [vmem:[#allocation3 + $0xa0] sm:$0xf] %v553_v48  ;;  %491 = vst [vmem:[#allocation3 + $0x80] sm:$0xf] %v481_v49 }
 0x12e   :  { %v324_v50 = vpop.permute.xlu1 %323  ;;  %v545_v51 = vpop.permute.xlu0 %544 }
 0x12f   :  { %v333_v52 = vsel %vm331_vm13, %v322_v27, %v324_v50  ;;  %v554_v53 = vsel %vm552_vm3, %v543_v46, %v545_v51  ;;  %v584_v27 = vld [vmem:[#allocation3 + $0x78] sm:$0xff] }
 0x130   :  { %343 = vst [vmem:[#allocation3 + $0x30] sm:$0xf] %v333_v52  ;;  %564 = vst [vmem:[#allocation3 + $0xa8] sm:$0xf] %v554_v53  ;;  %v1195_v31 = vpack.c.bf16 %v584_v27, %v579_v30  ;;  %v838_v30 = vld [vmem:[%s1607_s1 + $0x18] sm:$0x3] }
 0x132   :  { %v1504_v54 = vpop.permute.xlu1 %288  ;;  %v1506_v55 = vpop.permute.xlu0 %436 }
 0x133   :  { %v589_v39 = vld [vmem:[#allocation3 + $0xa0] sm:$0xf] }
 0x136   :  { %v1508_v56 = vpop.permute.xlu1 %362  ;;  %v1510_v57 = vpop.permute.xlu0 %510 }
 0x137   :  { %v590_v36 = vld [vmem:[#allocation3 + $0xa8] sm:$0xf] }
 0x13a   :  { %v287_v58 = vpop.permute.xlu1 %286  ;;  %v435_v59 = vpop.permute.xlu0 %434 }
 0x13b   :  { %v296_v60 = vsel %vm294_vm14, %v285_v23, %v287_v58  ;;  %v297_v61 = vsel %vm294_vm14, %v287_v58, %v1504_v54  ;;  %v444_v62 = vsel %vm442_vm0, %v433_v24, %v435_v59  ;;  %v445_v63 = vsel %vm442_vm0, %v435_v59, %v1506_v55 }
 0x13c   :  { %306 = vst [vmem:[#allocation3 + $0x8] sm:$0xf0] %v296_v60  ;;  %307 = vst [vmem:[#allocation3 + $0x10] sm:$0xf0] %v297_v61 }
 0x13d   :  { %454 = vst [vmem:[#allocation3 + $0x58] sm:$0xf0] %v444_v62  ;;  %455 = vst [vmem:[#allocation3 + $0x60] sm:$0xf0] %v445_v63 }
 0x13e   :  { %v361_v0 = vpop.permute.xlu1 %360  ;;  %v509_v1 = vpop.permute.xlu0 %508 }
 0x13f   :  { %v370_v3 = vsel %vm368_vm15, %v1486_v25, %v361_v0  ;;  %v371_v4 = vsel %vm368_vm15, %v361_v0, %v1508_v56  ;;  %v517_v5 = vsel %vm156_vm7, %v1488_v26, %v509_v1  ;;  %v518_v6 = vsel %vm156_vm7, %v509_v1, %v1510_v57 }
 0x140   :  { %380 = vst [vmem:[#allocation3 + $0x30] sm:$0xf0] %v370_v3  ;;  %381 = vst [vmem:[#allocation3 + $0x38] sm:$0xf0] %v371_v4 }
 0x141   :  { %527 = vst [vmem:[#allocation3 + $0x80] sm:$0xf0] %v517_v5  ;;  %528 = vst [vmem:[#allocation3 + $0x88] sm:$0xf0] %v518_v6 }
 0x142   :  { %v326_v7 = vpop.permute.xlu1 %325  ;;  %v400_v8 = vpop.permute.xlu0 %399 }
 0x143   :  { %v334_v9 = vsel %vm331_vm13, %v324_v50, %v326_v7  ;;  %v408_v10 = vsel %vm405_vm1, %v398_v43, %v400_v8  ;;  %v570_v16 = vld [vmem:[#allocation3 + $0x8] sm:$0xff]  ;;  %v571_v60 = vld [vmem:[#allocation3 + $0x10] sm:$0xff] }
 0x144   :  { %344 = vst [vmem:[#allocation3 + $0x38] sm:$0xf] %v334_v9  ;;  %418 = vst [vmem:[#allocation3 + $0x60] sm:$0xf] %v408_v10  ;;  %v580_v23 = vld [vmem:[#allocation3 + $0x58] sm:$0xff] }
 0x146   :  { %v1528_v11 = vpop.permute.xlu1 %401  ;;  %v474_v12 = vpop.permute.xlu0 %473 }
 0x147   :  { %v409_v14 = vsel %vm405_vm1, %v400_v8, %v1528_v11  ;;  %v482_v15 = vsel %vm479_vm2, %v472_v47, %v474_v12  ;;  %v575_v17 = vld [vmem:[#allocation3 + $0x30] sm:$0xff] }
 0x148   :  { %v585_v18 = vld [vmem:[#allocation3 + $0x80] sm:$0xff]  ;;  %419 = vst [vmem:[#allocation3 + $0x68] sm:$0xf] %v409_v14  ;;  %492 = vst [vmem:[#allocation3 + $0x88] sm:$0xf] %v482_v15  ;;  %v1189_v19 = vpack.c.bf16 %v575_v17, %v570_v16 }
 0x149   :  { %v1193_v26 = vpack.c.bf16 %v585_v18, %v580_v23 }
 0x14a   :  { %v1533_v24 = vpop.permute.xlu1 %475  ;;  %1190 = vmatprep.subr.bf16.mxu0 %v1189_v19  ;;  %v547_v25 = vpop.permute.xlu0 %546 }
 0x14b   :  { %v483_v28 = vsel %vm479_vm2, %v474_v12, %v1533_v24  ;;  %v555_v29 = vsel %vm552_vm3, %v545_v51, %v547_v25  ;;  %1192 = vmatpush1.bf16.msra.mxu0 %v1191_v22  ;;  %v576_v53 = vld [vmem:[#allocation3 + $0x38] sm:$0xff]  ;;  %v581_v6 = vld [vmem:[#allocation3 + $0x60] sm:$0xff]  ;;  %v836_v22 = vld [vmem:[%s1607_s1 + $0x8] sm:$0x3] }
 0x14c   :  { %493 = vst [vmem:[#allocation3 + $0x90] sm:$0xf] %v483_v28  ;;  %565 = vst [vmem:[#allocation3 + $0xb0] sm:$0xf] %v555_v29  ;;  %1194 = vmatprep.subr.bf16.mxu0 %v1193_v26  ;;  %v1199_v61 = vpack.c.bf16 %v576_v53, %v571_v60 }
 0x14e   :  { %v1538_v32 = vpop.permute.xlu1 %548  ;;  %v328_v33 = vpop.permute.xlu0 %327 }
 0x14f   :  { %v556_v34 = vsel %vm552_vm3, %v547_v25, %v1538_v32  ;;  %v335_v35 = vsel %vm331_vm13, %v326_v7, %v328_v33  ;;  %1196 = vmatpush1.bf16.msra.mxu0 %v1195_v31  ;;  %v586_v3 = vld [vmem:[#allocation3 + $0x88] sm:$0xff] }
 0x150   :  { %566 = vst [vmem:[#allocation3 + $0xb8] sm:$0xf] %v556_v34  ;;  %345 = vst [vmem:[#allocation3 + $0x40] sm:$0xf] %v335_v35  ;;  %1147 = vmatprep.subr.msk.mxu0 %vm602_vm4, %v590_v36  ;;  %v1203_v7 = vpack.c.bf16 %v586_v3, %v581_v6 }
 0x152   :  { %v439_v37 = vpop.permute.xlu1 %438  ;;  %v291_v38 = vpop.permute.xlu0 %290 }
 0x153   :  { %v446_v40 = vsel %vm442_vm0, %v1506_v55, %v439_v37  ;;  %v298_v41 = vsel %vm294_vm14, %v1504_v54, %v291_v38  ;;  %1148 = vmatpush1.msk.msra.mxu0 %vm602_vm4, %v589_v39  ;;  %v591_v16 = vld [vmem:[#allocation3 + $0xb0] sm:$0xf] }
 0x154   :  { %456 = vst [vmem:[#allocation3 + $0x68] sm:$0xf0] %v446_v40  ;;  %308 = vst [vmem:[#allocation3 + $0x18] sm:$0xf0] %v298_v41  ;;  %1149 = vmatmul.mubr.msk.f32.vlgmr.msra.gmra.mrb[0].mxu0 %vm599_vm5, %v1483_v20  ;;  %1205 = vmatprep.subr.bf16.mxu0 %v1304_v42 }
 0x155   :  { %1176 = vmatprep.mubr.msk.f32.mxu0 %vm1305_vm6, %v1264_v2 }
 0x156   :  { %v513_v43 = vpop.permute.xlu1 %512  ;;  %v365_v44 = vpop.permute.xlu0 %364 }
 0x157   :  { %v519_v45 = vsel %vm156_vm7, %v1510_v57, %v513_v43  ;;  %v372_v46 = vsel %vm368_vm15, %v1508_v56, %v365_v44  ;;  %v592_v12 = vld [vmem:[#allocation3 + $0xb8] sm:$0xf] }
 0x158   :  { %529 = vst [vmem:[#allocation3 + $0x90] sm:$0xf0] %v519_v45  ;;  %382 = vst [vmem:[#allocation3 + $0x40] sm:$0xf0] %v372_v46 }
 0x15a   :  { %v330_v47 = vpop.permute.xlu1 %329  ;;  %v293_v48 = vpop.permute.xlu0 %292 }
 0x15b   :  { %v336_v49 = vsel %vm331_vm13, %v328_v33, %v330_v47  ;;  %v299_v50 = vsel %vm294_vm14, %v291_v38, %v293_v48  ;;  %v572_v57 = vld [vmem:[#allocation3 + $0x18] sm:$0xff]  ;;  %v582_v62 = vld [vmem:[#allocation3 + $0x68] sm:$0xff] }
 0x15c   :  { %346 = vst [vmem:[#allocation3 + $0x48] sm:$0xf] %v336_v49  ;;  %309 = vst [vmem:[#allocation3 + $0x20] sm:$0xf0] %v299_v50 }
 0x15e   :  { %v404_v51 = vpop.permute.xlu1 %403  ;;  %v367_v52 = vpop.permute.xlu0 %366 }
 0x15f   :  { %v410_v54 = vsel %vm405_vm1, %v1528_v11, %v404_v51  ;;  %v373_v55 = vsel %vm368_vm15, %v365_v44, %v367_v52  ;;  %v577_v56 = vld [vmem:[#allocation3 + $0x40] sm:$0xff]  ;;  %v587_v58 = vld [vmem:[#allocation3 + $0x90] sm:$0xff] }
 0x160   :  { %420 = vst [vmem:[#allocation3 + $0x70] sm:$0xf] %v410_v54  ;;  %383 = vst [vmem:[#allocation3 + $0x48] sm:$0xf0] %v373_v55  ;;  %v1197_v59 = vpack.c.bf16 %v577_v56, %v572_v57  ;;  %v1201_v1 = vpack.c.bf16 %v587_v58, %v582_v62 }
 0x162   :  { %v478_v63 = vpop.permute.xlu1 %477  ;;  %1198 = vmatprep.subr.bf16.mxu1 %v1197_v59  ;;  %v441_v0 = vpop.permute.xlu0 %440 }
 0x163   :  { %v484_v4 = vsel %vm479_vm2, %v1533_v24, %v478_v63  ;;  %v447_v5 = vsel %vm442_vm0, %v439_v37, %v441_v0  ;;  %1200 = vmatpush1.bf16.msra.mxu1 %v1199_v61  ;;  %v573_v13 = vld [vmem:[#allocation3 + $0x20] sm:$0xff]  ;;  %v837_v37 = vld [vmem:[%s1607_s1 + $0x10] sm:$0x3] }
 0x164   :  { %494 = vst [vmem:[#allocation3 + $0x98] sm:$0xf] %v484_v4  ;;  %457 = vst [vmem:[#allocation3 + $0x70] sm:$0xf0] %v447_v5  ;;  %1202 = vmatprep.subr.bf16.mxu1 %v1201_v1 }
 0x166   :  { %v551_v8 = vpop.permute.xlu1 %550  ;;  %v515_v9 = vpop.permute.xlu0 %514 }
 0x167   :  { %v557_v10 = vsel %vm552_vm3, %v1538_v32, %v551_v8  ;;  %v520_v11 = vsel %vm156_vm7, %v513_v43, %v515_v9  ;;  %1204 = vmatpush1.bf16.msra.mxu1 %v1203_v7  ;;  %v578_v14 = vld [vmem:[#allocation3 + $0x48] sm:$0xff]  ;;  %v1050_v43 = vld [vmem:[%s1607_s1 + $0x28] sm:$0xff]  ;;  %vm1052_vm7 = vcmask 64512  }
 0x168   :  { %567 = vst [vmem:[#allocation3 + $0xc0] sm:$0xf] %v557_v10  ;;  %530 = vst [vmem:[#allocation3 + $0x98] sm:$0xf0] %v520_v11  ;;  %1150 = vmatprep.subr.msk.mxu1 %vm602_vm4, %v592_v12  ;;  %v1206_v15 = vpack.c.bf16 %v578_v14, %v573_v13 }
 0x16a   :  { %1207 = vmatpush3.bf16.msra.mxu0 %v1206_v15 }
 0x16b   :  { %1151 = vmatpush1.msk.msra.mxu1 %vm602_vm4, %v591_v16  ;;  %1208 = vmatprep.subr.bf16.mxu0 %v1304_v42  ;;  %v583_v17 = vld [vmem:[#allocation3 + $0x70] sm:$0xff]  ;;  %v839_v42 = vld [vmem:[%s1607_s1 + $0x20] sm:$0x3] }
 0x16c   :  { %1152 = vmatmul.mubr.msk.f32.vlgmr.msra.gmra.mrb[0].mxu1 %vm599_vm5, %v1483_v20 }
 0x16d   :  { %904 = vmatprep.mubr.f32.mxu1 %v836_v22 }
 0x16f   :  { %v588_v18 = vld [vmem:[#allocation3 + $0x98] sm:$0xff]  ;;  %v593_v21 = vld [vmem:[#allocation3 + $0xc0] sm:$0xf] }
 0x170   :  { %v1209_v19 = vpack.c.bf16 %v588_v18, %v583_v17 }
 0x172   :  { %1210 = vmatpush3.bf16.msra.mxu0 %v1209_v19 }
 0x173   :  { %1174 = vmatprep.subr.mxu0 %v1264_v2 }
 0x176   :  { %1175 = vmatpush3.msk.msra.mxu0 %vm602_vm4, %v593_v21 }
 0x177   :  { %1177 = vmatmul.mubr.msk.f32.vlgmr.msra.gmra.mrb[2].mxu0 %vm599_vm5, %v1483_v20  ;;  %1184 = vmatprep.subr.mxu0 %v1264_v2  ;;  %v597_v23 = vpop.permute.xlu0 %596  ;;  %v835_v20 = vld [vmem:[%s1607_s1] sm:$0x3] }
 0x178   :  { %1186 = vmatprep.mubr.msk.f32.mxu0 %vm1305_vm6, %v1264_v2  ;;  %1185 = vmatpush3.msra.mxu0 %v1050_v43 }
 0x227   :  { %v684_v24 = vpop.f32.mrb[0].mxu0 }
 0x228   :  { %v686_v25 = vpop.f32.mrb[1].mxu0  ;;  %v685_v26 = vadd.f32 %v684_v24, %v597_v23 }
 0x229   :  { %v687_v27 = vadd.f32 %v686_v25, %v597_v23 }
 0x22a   :  { %v830_v28 = vmax.f32 %v685_v26, 0.0 }
 0x22b   :  { %v831_v29 = vmax.f32 %v687_v27, 0.0 }
 0x22d   :  { %840 = vmatprep.subr.mxu1 %v831_v29 }
 0x22e   :  { %841 = vmatpush1.xpose.msra.mxu1 %v830_v28 }
 0x231   :  { %905 = vmatmul.mubr.f32.vlgmr.msra.gmra.mrb[2].mxu1 %v835_v20 }
 0x232   :  { %974 = vmatprep.mubr.f32.mxu1 %v838_v30 }
 0x23f   :  { %v755_v31 = vpop.f32.mrb[0].mxu1 }
 0x240   :  { %v756_v32 = vadd.f32 %v755_v31, %v597_v23  ;;  %v757_v33 = vpop.f32.mrb[1].mxu1 }
 0x241   :  { %v758_v34 = vadd.f32 %v757_v33, %v597_v23 }
 0x242   :  { %v832_v36 = vmax.f32 %v756_v32, 0.0 }
 0x243   :  { %v833_v35 = vmax.f32 %v758_v34, 0.0 }
 0x245   :  { %910 = vmatprep.subr.mxu1 %v833_v35 }
 0x246   :  { %911 = vmatpush1.xpose.msra.mxu1 %v832_v36 }
 0x247   :  { %1179 = vmatprep.subr.mxu1 %v1264_v2 }
 0x249   :  { %975 = vmatmul.mubr.f32.vlgmr.msra.gmra.mrb[2].mxu1 %v837_v37 }
 0x24a   :  { %v826_v38 = vpop.f32.mrb[2].mxu0  ;;  %1181 = vmatprep.mubr.msk.f32.mxu1 %vm1305_vm6, %v1264_v2  ;;  %v1051_v2 = vld [vmem:[%s1607_s1 + $0x30] ss:$0 sm:$0xff] }
 0x24b   :  { %v827_v39 = vadd.f32 %v826_v38, %v597_v23  ;;  %v1178_v40 = vpop.f32.mrb[3].mxu0 }
 0x24d   :  { %v834_v41 = vmax.f32 %v827_v39, 0.0 }
 0x24f   :  { %1180 = vmatpush3.xpose.msra.mxu1 %v834_v41 }
 0x252   :  { %1182 = vmatmul.mubr.f32.vlgmr.msra.gmra.mrb[2].mxu1 %v839_v42 }
 0x325   :  { %v1046_v44 = vpop.f32.mrb[2].mxu1 }
 0x326   :  { %v1183_v45 = vpop.f32.mrb[3].mxu1  ;;  %1187 = vmatmul.mubr.msk.f32.vlgmr.msra.gmra.mrb[4].mxu0 %vm1052_vm7, %v1046_v44 }
 0x3f9   :  { %v1122_v46 = vpop.f32.mrb[4].mxu0 }
 0x3fa   :  { %v1123_v47 = vadd.f32 %v1122_v46, %v1051_v2  ;;  %v1188_v48 = vpop.f32.mrb[5].mxu0 }
 0x3fc   :  { %1126 = vst [vmem:[%s1608_s2] sm:$0x3] %v1123_v47 }

</bundles_post_ra>
